<compile_context>
chip_gen: v6e
topology: v6e:2x2x1
jax: 0.10.0
libtpu: 0.0.40
codegen_flags: <defaults>
</compile_context>

<pallas_src>
import jax
import jax.numpy as jnp
from jax.experimental import pallas as pl
from jax.experimental.pallas import tpu as pltpu

_OUT_LANES = 128  # lane-dense output slab width


def _melu_kernel(x_ref, book_ref, user_ref, gender_ref, age_ref,
                 w1_ref, b1_ref, w2_ref, b2_ref, w3_ref, b3_ref, o_ref):
    idx = x_ref[...]                       # (B, 4) int32, fully vector-resident
    B = idx.shape[0]
    E = book_ref.shape[1]
    H1 = w1_ref.shape[1]

    # fc1 without ever materializing the (B, 4E) concat:
    #   feat @ W1 == sum_t  onehot_t @ table_t @ W1[t*E:(t+1)*E]
    acc = jnp.zeros((B, H1), jnp.float32)
    for t, tbl_ref in enumerate((book_ref, user_ref, gender_ref, age_ref)):
        tbl = tbl_ref[...]                                        # (num_t, E)
        num_t = tbl.shape[0]
        ids = idx[:, t:t + 1]                                     # (B, 1)
        iota = jax.lax.broadcasted_iota(jnp.int32, (B, num_t), 1)
        one_hot = (ids == iota).astype(jnp.float32)               # (B, num_t)
        emb = jnp.dot(one_hot, tbl,
                      preferred_element_type=jnp.float32)         # (B, E)
        w1_t = w1_ref[t * E:(t + 1) * E, :]                       # (E, H1) static slice
        acc = acc + jnp.dot(emb, w1_t,
                            preferred_element_type=jnp.float32)   # (B, H1)

    h1 = jnp.maximum(acc + b1_ref[...], 0.0)                      # fc1 + ReLU
    h2 = jnp.dot(h1, w2_ref[...],
                 preferred_element_type=jnp.float32) + b2_ref[...]
    h2 = jnp.maximum(h2, 0.0)                                     # fc2 + ReLU

    # linear_out (out_features == 1): VPU multiply + lane reduce, not an MXU pass.
    logits = jnp.sum(h2 * w3_ref[...], axis=-1, keepdims=True) + b3_ref[...]  # (B, 1)
    sig = jax.nn.sigmoid(logits)

    # Lane-dense, unmasked store; the wrapper slices column 0.
    o_ref[...] = jnp.broadcast_to(sig, o_ref.shape)


def user_preference_estimator_forward(x_idx, params):
    """x_idx: (B, 4) int32 indices [book, user, gender, age] -> (B, 1) f32."""
    B = x_idx.shape[0]
    vmem = pl.BlockSpec(memory_space=pltpu.MemorySpace.VMEM)
    out_slab = pl.pallas_call(
        _melu_kernel,
        out_shape=jax.ShapeDtypeStruct((B, _OUT_LANES), jnp.float32),
        in_specs=[vmem] * 11,
        out_specs=vmem,
    )(
        x_idx,
        params["book_table"], params["user_table"],
        params["gender_table"], params["age_table"],
        params["w1"], params["b1"],
        params["w2"], params["b2"],
        params["w3_row"], params["b3"],
    )
    return out_slab[:, :1]


def init_params(key, *, embedding_dim, first_fc_hidden_dim, second_fc_hidden_dim,
                num_books, num_users, num_genders, num_ages):
    fc1_in = embedding_dim * 4
    keys = jax.random.split(key, 10)

    def uniform(k, shape, bound):
        return jax.random.uniform(k, shape, jnp.float32, -bound, bound)

    return {
        # Embedding tables (nn.Embedding default init ~ N(0,1)).
        "book_table":   jax.random.normal(keys[0], (num_books, embedding_dim), jnp.float32),
        "user_table":   jax.random.normal(keys[1], (num_users, embedding_dim), jnp.float32),
        "gender_table": jax.random.normal(keys[2], (num_genders, embedding_dim), jnp.float32),
        "age_table":    jax.random.normal(keys[3], (num_ages, embedding_dim), jnp.float32),
        # Linear layers stored as (in, out) so the kernel computes x @ W + b;
        # biases as (1, out). w3 is stored as a (1, H2) row (PyTorch layout).
        "w1": uniform(keys[4], (fc1_in, first_fc_hidden_dim), 1.0 / fc1_in ** 0.5),
        "b1": uniform(keys[5], (1, first_fc_hidden_dim), 1.0 / fc1_in ** 0.5),
        "w2": uniform(keys[6], (first_fc_hidden_dim, second_fc_hidden_dim),
                      1.0 / first_fc_hidden_dim ** 0.5),
        "b2": uniform(keys[7], (1, second_fc_hidden_dim), 1.0 / first_fc_hidden_dim ** 0.5),
        "w3_row": uniform(keys[8], (1, second_fc_hidden_dim), 1.0 / second_fc_hidden_dim ** 0.5),
        "b3": uniform(keys[9], (1, 1), 1.0 / second_fc_hidden_dim ** 0.5),
    }


if __name__ == "__main__":
    EMB = 8    # embedding_dim -> fc1_in = 32
    H1 = 32    # first_fc_hidden_dim
    H2 = 32    # second_fc_hidden_dim
    B = 8      # batch

    key = jax.random.PRNGKey(0)
    pkey, xkey = jax.random.split(key)
    params = init_params(
        pkey,
        embedding_dim=EMB,
        first_fc_hidden_dim=H1,
        second_fc_hidden_dim=H2,
        num_books=50, num_users=40, num_genders=2, num_ages=7,
    )

    k0, k1, k2, k3 = jax.random.split(xkey, 4)
    x_idx = jnp.stack(
        [
            jax.random.randint(k0, (B,), 0, 50),
            jax.random.randint(k1, (B,), 0, 40),
            jax.random.randint(k2, (B,), 0, 2),
            jax.random.randint(k3, (B,), 0, 7),
        ],
        axis=1,
    ).astype(jnp.int32)  # (B, 4)

    out = user_preference_estimator_forward(x_idx, params)
    out = jax.block_until_ready(out)

    # Pure-JAX reference (gather + concat + MLP), matching the PyTorch module.
    item_emb = jnp.take(params["book_table"], x_idx[:, 0], axis=0)
    user_emb = jnp.concatenate(
        [
            jnp.take(params["user_table"], x_idx[:, 1], axis=0),
            jnp.take(params["gender_table"], x_idx[:, 2], axis=0),
            jnp.take(params["age_table"], x_idx[:, 3], axis=0),
        ],
        axis=1,
    )
    feat = jnp.concatenate([item_emb, user_emb], axis=1)
    h1 = jnp.maximum(feat @ params["w1"] + params["b1"], 0.0)
    h2 = jnp.maximum(h1 @ params["w2"] + params["b2"], 0.0)
    ref = jax.nn.sigmoid(h2 @ params["w3_row"].T + params["b3"])

    assert out.shape == (B, 1), out.shape
    assert jnp.allclose(out, ref, atol=1e-5, rtol=1e-5), (out, ref)
    print("KERNEL_OK")
</pallas_src>

<mosaic_0001>
module attributes {stable_mosaic.version = 11 : i64} {
  func.func @_melu_kernel(%arg0: memref<8x4xi32, #tpu.memory_space<vmem>>, %arg1: memref<50x8xf32, #tpu.memory_space<vmem>>, %arg2: memref<40x8xf32, #tpu.memory_space<vmem>>, %arg3: memref<2x8xf32, #tpu.memory_space<vmem>>, %arg4: memref<7x8xf32, #tpu.memory_space<vmem>>, %arg5: memref<32x32xf32, #tpu.memory_space<vmem>>, %arg6: memref<1x32xf32, #tpu.memory_space<vmem>>, %arg7: memref<32x32xf32, #tpu.memory_space<vmem>>, %arg8: memref<1x32xf32, #tpu.memory_space<vmem>>, %arg9: memref<1x32xf32, #tpu.memory_space<vmem>>, %arg10: memref<1x1xf32, #tpu.memory_space<vmem>>, %arg11: memref<8x128xf32, #tpu.memory_space<vmem>>) attributes {dimension_semantics = [], scalar_prefetch = 0 : i64, scratch_operands = 0 : i64, tpu.core_type = #tpu.core_type<tc>} {
    %c0 = arith.constant 0 : index
    %c0_0 = arith.constant 0 : index
    %0 = vector.load %arg0[%c0, %c0_0] : memref<8x4xi32, #tpu.memory_space<vmem>>, vector<8x4xi32>
    %cst = arith.constant 0.000000e+00 : f32
    %1 = vector.broadcast %cst : f32 to vector<8x32xf32>
    %c0_1 = arith.constant 0 : index
    %c0_2 = arith.constant 0 : index
    %2 = vector.load %arg1[%c0_1, %c0_2] : memref<50x8xf32, #tpu.memory_space<vmem>>, vector<50x8xf32>
    %3 = vector.extract_strided_slice %0 {offsets = [0, 0], sizes = [8, 1], strides = [1, 1]} : vector<8x4xi32> to vector<8x1xi32>
    %4 = tpu.iota {dimensions = array<i32: 1>} : vector<8x50xi32>
    %5 = vector.broadcast %3 : vector<8x1xi32> to vector<8x50xi32>
    %6 = arith.cmpi eq, %5, %4 : vector<8x50xi32>
    %7 = arith.extui %6 : vector<8x50xi1> to vector<8x50xi32>
    %8 = arith.sitofp %7 : vector<8x50xi32> to vector<8x50xf32>
    %cst_3 = arith.constant dense<0.000000e+00> : vector<8x8xf32>
    %9 = tpu.matmul %8, %2, %cst_3 {dimension_numbers = #tpu.dot_dimension_numbers<[1], [0], [0], [1], [0, 0, 1, 1], [], []>} : vector<8x50xf32>, vector<50x8xf32>, vector<8x8xf32> -> vector<8x8xf32>
    %c0_4 = arith.constant 0 : index
    %c0_5 = arith.constant 0 : index
    %10 = vector.load %arg5[%c0_4, %c0_5] : memref<32x32xf32, #tpu.memory_space<vmem>>, vector<8x32xf32>
    %cst_6 = arith.constant dense<0.000000e+00> : vector<8x32xf32>
    %11 = tpu.matmul %9, %10, %cst_6 {dimension_numbers = #tpu.dot_dimension_numbers<[1], [0], [0], [1], [0, 0, 1, 1], [], []>} : vector<8x8xf32>, vector<8x32xf32>, vector<8x32xf32> -> vector<8x32xf32>
    %12 = arith.addf %1, %11 : vector<8x32xf32>
    %c0_7 = arith.constant 0 : index
    %c0_8 = arith.constant 0 : index
    %13 = vector.load %arg2[%c0_7, %c0_8] : memref<40x8xf32, #tpu.memory_space<vmem>>, vector<40x8xf32>
    %14 = vector.extract_strided_slice %0 {offsets = [0, 1], sizes = [8, 1], strides = [1, 1]} : vector<8x4xi32> to vector<8x1xi32>
    %15 = tpu.iota {dimensions = array<i32: 1>} : vector<8x40xi32>
    %16 = vector.broadcast %14 : vector<8x1xi32> to vector<8x40xi32>
    %17 = arith.cmpi eq, %16, %15 : vector<8x40xi32>
    %18 = arith.extui %17 : vector<8x40xi1> to vector<8x40xi32>
    %19 = arith.sitofp %18 : vector<8x40xi32> to vector<8x40xf32>
    %cst_9 = arith.constant dense<0.000000e+00> : vector<8x8xf32>
    %20 = tpu.matmul %19, %13, %cst_9 {dimension_numbers = #tpu.dot_dimension_numbers<[1], [0], [0], [1], [0, 0, 1, 1], [], []>} : vector<8x40xf32>, vector<40x8xf32>, vector<8x8xf32> -> vector<8x8xf32>
    %c8 = arith.constant 8 : index
    %c0_10 = arith.constant 0 : index
    %21 = vector.load %arg5[%c8, %c0_10] : memref<32x32xf32, #tpu.memory_space<vmem>>, vector<8x32xf32>
    %cst_11 = arith.constant dense<0.000000e+00> : vector<8x32xf32>
    %22 = tpu.matmul %20, %21, %cst_11 {dimension_numbers = #tpu.dot_dimension_numbers<[1], [0], [0], [1], [0, 0, 1, 1], [], []>} : vector<8x8xf32>, vector<8x32xf32>, vector<8x32xf32> -> vector<8x32xf32>
    %23 = arith.addf %12, %22 : vector<8x32xf32>
    %c0_12 = arith.constant 0 : index
    %c0_13 = arith.constant 0 : index
    %24 = vector.load %arg3[%c0_12, %c0_13] : memref<2x8xf32, #tpu.memory_space<vmem>>, vector<2x8xf32>
    %25 = vector.extract_strided_slice %0 {offsets = [0, 2], sizes = [8, 1], strides = [1, 1]} : vector<8x4xi32> to vector<8x1xi32>
    %26 = tpu.iota {dimensions = array<i32: 1>} : vector<8x2xi32>
    %27 = vector.broadcast %25 : vector<8x1xi32> to vector<8x2xi32>
    %28 = arith.cmpi eq, %27, %26 : vector<8x2xi32>
    %29 = arith.extui %28 : vector<8x2xi1> to vector<8x2xi32>
    %30 = arith.sitofp %29 : vector<8x2xi32> to vector<8x2xf32>
    %cst_14 = arith.constant dense<0.000000e+00> : vector<8x8xf32>
    %31 = tpu.matmul %30, %24, %cst_14 {dimension_numbers = #tpu.dot_dimension_numbers<[1], [0], [0], [1], [0, 0, 1, 1], [], []>} : vector<8x2xf32>, vector<2x8xf32>, vector<8x8xf32> -> vector<8x8xf32>
    %c16 = arith.constant 16 : index
    %c0_15 = arith.constant 0 : index
    %32 = vector.load %arg5[%c16, %c0_15] : memref<32x32xf32, #tpu.memory_space<vmem>>, vector<8x32xf32>
    %cst_16 = arith.constant dense<0.000000e+00> : vector<8x32xf32>
    %33 = tpu.matmul %31, %32, %cst_16 {dimension_numbers = #tpu.dot_dimension_numbers<[1], [0], [0], [1], [0, 0, 1, 1], [], []>} : vector<8x8xf32>, vector<8x32xf32>, vector<8x32xf32> -> vector<8x32xf32>
    %34 = arith.addf %23, %33 : vector<8x32xf32>
    %c0_17 = arith.constant 0 : index
    %c0_18 = arith.constant 0 : index
    %35 = vector.load %arg4[%c0_17, %c0_18] : memref<7x8xf32, #tpu.memory_space<vmem>>, vector<7x8xf32>
    %36 = vector.extract_strided_slice %0 {offsets = [0, 3], sizes = [8, 1], strides = [1, 1]} : vector<8x4xi32> to vector<8x1xi32>
    %37 = tpu.iota {dimensions = array<i32: 1>} : vector<8x7xi32>
    %38 = vector.broadcast %36 : vector<8x1xi32> to vector<8x7xi32>
    %39 = arith.cmpi eq, %38, %37 : vector<8x7xi32>
    %40 = arith.extui %39 : vector<8x7xi1> to vector<8x7xi32>
    %41 = arith.sitofp %40 : vector<8x7xi32> to vector<8x7xf32>
    %cst_19 = arith.constant dense<0.000000e+00> : vector<8x8xf32>
    %42 = tpu.matmul %41, %35, %cst_19 {dimension_numbers = #tpu.dot_dimension_numbers<[1], [0], [0], [1], [0, 0, 1, 1], [], []>} : vector<8x7xf32>, vector<7x8xf32>, vector<8x8xf32> -> vector<8x8xf32>
    %c24 = arith.constant 24 : index
    %c0_20 = arith.constant 0 : index
    %43 = vector.load %arg5[%c24, %c0_20] : memref<32x32xf32, #tpu.memory_space<vmem>>, vector<8x32xf32>
    %cst_21 = arith.constant dense<0.000000e+00> : vector<8x32xf32>
    %44 = tpu.matmul %42, %43, %cst_21 {dimension_numbers = #tpu.dot_dimension_numbers<[1], [0], [0], [1], [0, 0, 1, 1], [], []>} : vector<8x8xf32>, vector<8x32xf32>, vector<8x32xf32> -> vector<8x32xf32>
    %45 = arith.addf %34, %44 : vector<8x32xf32>
    %c0_22 = arith.constant 0 : index
    %c0_23 = arith.constant 0 : index
    %46 = vector.load %arg6[%c0_22, %c0_23] : memref<1x32xf32, #tpu.memory_space<vmem>>, vector<1x32xf32>
    %47 = vector.broadcast %46 : vector<1x32xf32> to vector<8x32xf32>
    %48 = arith.addf %45, %47 : vector<8x32xf32>
    %cst_24 = arith.constant 0.000000e+00 : f32
    %49 = vector.broadcast %cst_24 : f32 to vector<8x32xf32>
    %50 = arith.maximumf %48, %49 : vector<8x32xf32>
    %c0_25 = arith.constant 0 : index
    %c0_26 = arith.constant 0 : index
    %51 = vector.load %arg7[%c0_25, %c0_26] : memref<32x32xf32, #tpu.memory_space<vmem>>, vector<32x32xf32>
    %cst_27 = arith.constant dense<0.000000e+00> : vector<8x32xf32>
    %52 = tpu.matmul %50, %51, %cst_27 {dimension_numbers = #tpu.dot_dimension_numbers<[1], [0], [0], [1], [0, 0, 1, 1], [], []>} : vector<8x32xf32>, vector<32x32xf32>, vector<8x32xf32> -> vector<8x32xf32>
    %c0_28 = arith.constant 0 : index
    %c0_29 = arith.constant 0 : index
    %53 = vector.load %arg8[%c0_28, %c0_29] : memref<1x32xf32, #tpu.memory_space<vmem>>, vector<1x32xf32>
    %54 = vector.broadcast %53 : vector<1x32xf32> to vector<8x32xf32>
    %55 = arith.addf %52, %54 : vector<8x32xf32>
    %cst_30 = arith.constant 0.000000e+00 : f32
    %56 = vector.broadcast %cst_30 : f32 to vector<8x32xf32>
    %57 = arith.maximumf %55, %56 : vector<8x32xf32>
    %c0_31 = arith.constant 0 : index
    %c0_32 = arith.constant 0 : index
    %58 = vector.load %arg9[%c0_31, %c0_32] : memref<1x32xf32, #tpu.memory_space<vmem>>, vector<1x32xf32>
    %59 = vector.broadcast %58 : vector<1x32xf32> to vector<8x32xf32>
    %60 = arith.mulf %57, %59 : vector<8x32xf32>
    %cst_33 = arith.constant dense<0.000000e+00> : vector<8xf32>
    %61 = vector.multi_reduction <add>, %60, %cst_33 [1] : vector<8x32xf32> to vector<8xf32>
    %62 = vector.shape_cast %61 : vector<8xf32> to vector<8x1xf32>
    %c0_34 = arith.constant 0 : index
    %c0_35 = arith.constant 0 : index
    %63 = vector.load %arg10[%c0_34, %c0_35] : memref<1x1xf32, #tpu.memory_space<vmem>>, vector<1x1xf32>
    %64 = vector.broadcast %63 : vector<1x1xf32> to vector<8x1xf32>
    %65 = arith.addf %62, %64 : vector<8x1xf32>
    %66 = arith.negf %65 : vector<8x1xf32>
    %67 = math.exp %66 : vector<8x1xf32>
    %cst_36 = arith.constant 1.000000e+00 : f32
    %68 = vector.broadcast %cst_36 : f32 to vector<8x1xf32>
    %69 = arith.addf %68, %67 : vector<8x1xf32>
    %70 = arith.divf %68, %69 : vector<8x1xf32>
    %71 = vector.shape_cast %70 : vector<8x1xf32> to vector<8x1xf32>
    %72 = vector.broadcast %71 : vector<8x1xf32> to vector<8x128xf32>
    %c0_37 = arith.constant 0 : index
    %c0_38 = arith.constant 0 : index
    %73 = vector.load %arg11[%c0_37, %c0_38] : memref<8x128xf32, #tpu.memory_space<vmem>>, vector<8x128xf32>
    tpu.vector_store %arg11[%c0_37, %c0_38], %72 {strides = array<i32>} : memref<8x128xf32, #tpu.memory_space<vmem>>, vector<8x128xf32>,
    return
  }
}

</mosaic_0001>

<bundles_post_ra>
// kernel: tpu_custom_call.1
= control target key start
LH: loop header
LB: loop body
LE: loop exit
PB: predicated region body
PF: predicated region fallthrough
CT: control target
= control target key end

     0   :  { %s1189_s0 = inlined_call_operand.vmem [shape: s32[8,4], index: 0, kind: input, shape index: {}]   ;;  %s1190_s1 = inlined_call_operand.vmem [shape: f32[50,8], index: 1, kind: input, shape index: {}]   ;;  %s1191_s2 = inlined_call_operand.vmem [shape: f32[40,8], index: 2, kind: input, shape index: {}]   ;;  %s1192_s3 = inlined_call_operand.vmem [shape: f32[2,8], index: 3, kind: input, shape index: {}]   ;;  %s1193_s4 = inlined_call_operand.vmem [shape: f32[7,8], index: 4, kind: input, shape index: {}]   ;;  %s1194_s5 = inlined_call_operand.vmem [shape: f32[32,32], index: 5, kind: input, shape index: {}]   ;;  %s1195_s6 = inlined_call_operand.vmem [shape: f32[1,32], index: 6, kind: input, shape index: {}]   ;;  %s1196_s7 = inlined_call_operand.vmem [shape: f32[32,32], index: 7, kind: input, shape index: {}]   ;;  %s1197_s8 = inlined_call_operand.vmem [shape: f32[1,32], index: 8, kind: input, shape index: {}]   ;;  %s1198_s9 = inlined_call_operand.vmem [shape: f32[1,32], index: 9, kind: input, shape index: {}]   ;;  %s1199_s10 = inlined_call_operand.<no memory space> [shape: f32[1,1], index: 10, kind: input, shape index: {}]   ;;  %s1200_s11 = inlined_call_operand.hbm [shape: f32[8,128], index: 11, kind: output, shape index: {}]  }
   0x1   :  { %v16_v0 = vstv %s1199_s10 }
   0x2   :  { %17 = vst [vmem:[#allocation2] sm:$0x1] %v16_v0 }
   0x3   :  { %v41_v1 = vld [vmem:[%s1189_s0] sm:$0xff]  ;;  %vm61_vm0 = vcmask 1041408   ;;  %v988_v3 = vmov 1   ;;  %v989_v4 = vmov 0.0   ;;  %v48_v5 = vld [vmem:[%s1190_s1 + $0x30] sm:$0x3] }
   0x4   :  { %v140_v2 = vld [vmem:[%s1191_s2 + $0x20] sm:$0xff]  ;;  %958 = vset.pattern.permute.xlu0 %v988_v3  ;;  %897 = vmatprep.subr.mxu1 %v989_v4  ;;  %v139_v6 = vld [vmem:[%s1191_s2 + $0x18] sm:$0xff]  ;;  %v47_v7 = vld [vmem:[%s1190_s1 + $0x28] sm:$0xff] }
   0x5   :  { %142 = vperm.xlu0 %958, %v41_v1   ;;  %880 = vmatprep.subr.mxu0 %v989_v4 }
   0x6   :  { %898 = vmatpush3.msra.mxu1 %v140_v2  ;;  %881 = vmatpush3.msk.msra.mxu0 %vm61_vm0, %v48_v5 }
   0x7   :  { %899 = vmatprep.subr.mxu1 %v989_v4  ;;  %882 = vmatprep.subr.mxu0 %v989_v4 }
   0x8   :  { %18 = vsyncpa [#allocation4], 0  ;;  %900 = vmatpush3.msra.mxu1 %v139_v6  ;;  %883 = vmatpush3.msra.mxu0 %v47_v7  ;;  %v138_v8 = vld [vmem:[%s1191_s2 + $0x10] sm:$0xff]  ;;  %v46_v9 = vld [vmem:[%s1190_s1 + $0x20] sm:$0xff]  ;;  %v990_v10 = vmov 0   ;;  %vm991_vm1 = vmmov 0   ;;  %v49_v19 = vlaneseq }
   0x9   :  { %959 = vset.pattern.permute.xlu0 %v990_v10  ;;  %901 = vmatprep.subr.mxu1 %v989_v4  ;;  %v137_v11 = vld [vmem:[%s1191_s2 + $0x8] sm:$0xff]  ;;  %v45_v12 = vld [vmem:[%s1190_s1 + $0x18] sm:$0xff]  ;;  %v136_v13 = vld [vmem:[%s1191_s2] sm:$0xff]  ;;  %v992_v17 = vmov 2   ;;  %v993_v18 = vmov 3   ;;  %vm147_vm2 = vcmask 326656  }
   0xa   :  { %52 = vperm.xlu0 %959, %v41_v1   ;;  %884 = vmatprep.subr.mxu0 %v989_v4  ;;  %v44_v14 = vld [vmem:[%s1190_s1 + $0x10] sm:$0xff]  ;;  %v43_v15 = vld [vmem:[%s1190_s1 + $0x8] sm:$0xff]  ;;  %v42_v16 = vld [vmem:[%s1190_s1] sm:$0xff]  ;;  %v50_v20 = vand.u32 127, %v49_v19  ;;  %vm57_vm4 = vcmask 408576   ;;  %vm222_vm6 = vcmask 64512  }
   0xb   :  { %902 = vmatpush3.msra.mxu1 %v138_v8  ;;  %885 = vmatpush3.msra.mxu0 %v46_v9  ;;  %v221_v22 = vld [vmem:[%s1194_s5 + $0x8] sm:$0xff]  ;;  %v135_v26 = vld [vmem:[%s1194_s5] sm:$0xff]  ;;  %vm376_vm8 = vcmask 15360   ;;  %vm539_vm9 = vcmask 1046528   ;;  %vm535_vm11 = vcmask 56320   ;;  %v453_v37 = vld [vmem:[%s1194_s5 + $0x10] sm:$0xff] }
   0xc   :  { %903 = vmatprep.subr.mxu1 %v989_v4  ;;  %886 = vmatprep.subr.mxu0 %v989_v4  ;;  %v369_v28 = vld [vmem:[%s1192_s3] sm:$0x3]  ;;  %v613_v40 = vld [vmem:[%s1194_s5 + $0x18] sm:$0xff]  ;;  %v699_v49 = vld [vmem:[%s1196_s7 + $0x10] sm:$0xff]  ;;  %vm708_vm12 = vcmask 261120  }
   0xd   :  { %904 = vmatpush3.msra.mxu1 %v137_v11  ;;  %887 = vmatpush3.msra.mxu0 %v45_v12  ;;  %v528_v33 = vld [vmem:[%s1193_s4] sm:$0x7f]  ;;  %v700_v48 = vld [vmem:[%s1196_s7 + $0x18] sm:$0xff]  ;;  %v698_v50 = vld [vmem:[%s1196_s7 + $0x8] sm:$0xff] }
   0xe   :  { %905 = vmatprep.subr.mxu1 %v989_v4  ;;  %888 = vmatprep.subr.mxu0 %v989_v4  ;;  %v697_v51 = vld [vmem:[%s1196_s7] sm:$0xff] }
   0xf   :  { %906 = vmatpush3.msra.mxu1 %v136_v13  ;;  %907 = vmatprep.mubr.msk.f32.mxu1 %vm991_vm1, %v989_v4  ;;  %v843_v56 = vld [vmem:[%s1195_s6] ss:$0 sm:$0xff]  ;;  %s994_s6 = smov [#allocation3]  }
  0x10   :  { %889 = vmatpush3.msra.mxu0 %v44_v14  ;;  %894 = vmatprep.mubr.msk.f32.mxu0 %vm991_vm1, %v989_v4  ;;  %v844_v61 = vld [vmem:[%s1197_s8] ss:$0 sm:$0xff]  ;;  %s820_s8 = sshll.u32 %s994_s6, 4  ;;  %s821_s8 = int_to_ptr.vmem [resolvable:$true] %s820_s8 }
  0x11   :  { %890 = vmatprep.subr.mxu0 %v989_v4  ;;  %960 = vset.pattern.permute.xlu1 %v992_v17  ;;  %v847_v5 = vld [vmem:[#allocation2] ss:$0 sm:$0xff]  ;;  %p971_p1 = scmp.lt.s32.totalorder %s821_s8, %s821_s8 }
  0x12   :  { %891 = vmatpush3.msra.mxu0 %v43_v15  ;;  %371 = vperm.xlu1 %960, %v41_v1  }
  0x13   :  { %892 = vmatprep.subr.mxu0 %v989_v4  ;;  %910 = vmatprep.subr.mxu1 %v989_v4 }
  0x14   :  { %893 = vmatpush3.msra.mxu0 %v42_v16 }
  0x15   :  { %915 = vmatprep.subr.mxu0 %v989_v4 }
  0x16   :  { %961 = vset.pattern.permute.xlu1 %v993_v18 }
  0x17   :  { %530 = vperm.xlu1 %961, %v41_v1   ;;  %v846_v1 = vld [vmem:[%s1198_s9] ss:$0 sm:$0xff]  ;;  %s966_s9 = scalar_lea.vmem %s821_s8, 128 }
  0x18   :  { %p967_p0 = scmp.ne.s32.totalorder %s821_s8, %s966_s9  ;;  %p972_p2 = scmp.lt.s32.totalorder %s966_s9, %s966_s9 }
  0x1a   :  { %p973_p3 = por %p972_p2, %p971_p1 }
  0x1c   :  { %p974_p4 = pnand %p973_p3, %p967_p0 }
  0x80   :  { %v143_v21 = vpop.permute.xlu0 %142 }
  0x81   :  { %vm144_vm3 = vcmp.eq.s32.totalorder %v143_v21, %v50_v20 }
  0x82   :  { %v831_v23 = vsel %vm144_vm3, 1.0, %v989_v4 }
  0x83   :  { %908 = vmatmul.mubr.msk.f32.vlgmr.msra.gmra.mxu1 %vm147_vm2, %v831_v23 }
  0x84   :  { %911 = vmatpush3.msra.mxu1 %v221_v22  ;;  %912 = vmatprep.mubr.msk.f32.mxu1 %vm991_vm1, %v989_v4 }
  0x85   :  { %v53_v24 = vpop.permute.xlu0 %52  ;;  %920 = vmatprep.subr.mxu1 %v989_v4 }
  0x86   :  { %vm54_vm5 = vcmp.eq.s32.totalorder %v53_v24, %v50_v20 }
  0x87   :  { %v828_v25 = vsel %vm54_vm5, 1.0, %v989_v4 }
  0x88   :  { %895 = vmatmul.mubr.msk.f32.vlgmr.msra.gmra.mxu0 %vm57_vm4, %v828_v25 }
  0x89   :  { %917 = vmatprep.mubr.msk.f32.mxu0 %vm991_vm1, %v989_v4  ;;  %916 = vmatpush3.msra.mxu0 %v135_v26 }
  0x8a   :  { %925 = vmatprep.subr.mxu0 %v989_v4 }
  0x8d   :  { %v372_v27 = vpop.permute.xlu1 %371 }
  0x8e   :  { %vm373_vm7 = vcmp.eq.s32.totalorder %v372_v27, %v50_v20 }
  0x8f   :  { %v835_v31 = vsel %vm373_vm7, 1.0, %v989_v4 }
  0x92   :  { %v531_v30 = vpop.permute.xlu1 %530 }
  0x93   :  { %vm532_vm10 = vcmp.eq.s32.totalorder %v531_v30, %v50_v20 }
  0x94   :  { %v839_v35 = vsel %vm532_vm10, 1.0, %v989_v4 }
 0x143   :  { %v217_v29 = vpop.f32.mrf.mxu1 }
 0x144   :  { %913 = vmatmul.mubr.msk.f32.vlgmr.msra.gmra.mxu1 %vm222_vm6, %v217_v29 }
 0x145   :  { %921 = vmatpush3.msk.msra.mxu1 %vm61_vm0, %v369_v28  ;;  %v909_v32 = vpop.f32.mrf.mxu1  ;;  %922 = vmatprep.mubr.msk.f32.mxu1 %vm991_vm1, %v989_v4 }
 0x146   :  { %930 = vmatprep.subr.mxu1 %v989_v4 }
 0x148   :  { %v131_v34 = vpop.f32.mrf.mxu0  ;;  %923 = vmatmul.mubr.msk.f32.vlgmr.msra.gmra.mxu1 %vm376_vm8, %v835_v31 }
 0x149   :  { %931 = vmatpush3.msk.msra.mxu1 %vm539_vm9, %v528_v33  ;;  %918 = vmatmul.mubr.msk.f32.vlgmr.msra.gmra.mxu0 %vm222_vm6, %v131_v34 }
 0x14a   :  { %932 = vmatprep.mubr.msk.f32.mxu1 %vm991_vm1, %v989_v4  ;;  %v896_v36 = vpop.f32.mrf.mxu0  ;;  %927 = vmatprep.mubr.msk.f32.mxu0 %vm991_vm1, %v989_v4 }
 0x14b   :  { %940 = vmatprep.subr.mxu1 %v989_v4  ;;  %926 = vmatpush3.msra.mxu0 %v453_v37 }
 0x14c   :  { %933 = vmatmul.mubr.msk.f32.vlgmr.msra.gmra.mxu1 %vm535_vm11, %v839_v35  ;;  %935 = vmatprep.subr.mxu0 %v989_v4 }
 0x14d   :  { %948 = vmatprep.mubr.msk.f32.mxu1 %vm991_vm1, %v989_v4  ;;  %941 = vmatpush3.msra.mxu1 %v700_v48 }
 0x14e   :  { %942 = vmatprep.subr.mxu1 %v989_v4 }
 0x14f   :  { %943 = vmatpush3.msra.mxu1 %v699_v49 }
 0x150   :  { %944 = vmatprep.subr.mxu1 %v989_v4 }
 0x151   :  { %945 = vmatpush3.msra.mxu1 %v698_v50 }
 0x152   :  { %946 = vmatprep.subr.mxu1 %v989_v4 }
 0x153   :  { %947 = vmatpush3.msra.mxu1 %v697_v51 }
 0x204   :  { %v292_v38 = vpop.f32.mrf.mxu1 }
 0x206   :  { %v914_v39 = vpop.f32.mrf.mxu1 }
 0x208   :  { %v449_v41 = vpop.f32.mrf.mxu1 }
 0x209   :  { %v365_v42 = vpop.f32.mrf.mxu0  ;;  %928 = vmatmul.mubr.msk.f32.vlgmr.msra.gmra.mxu0 %vm222_vm6, %v449_v41 }
 0x20a   :  { %v366_v43 = vadd.f32 %v365_v42, %v292_v38  ;;  %936 = vmatpush3.msra.mxu0 %v613_v40  ;;  %v924_v44 = vpop.f32.mrf.mxu1  ;;  %937 = vmatprep.mubr.msk.f32.mxu0 %vm991_vm1, %v989_v4 }
 0x20b   :  { %v919_v45 = vpop.f32.mrf.mxu0 }
 0x20c   :  { %v609_v46 = vpop.f32.mrf.mxu1 }
 0x20d   :  { %938 = vmatmul.mubr.msk.f32.vlgmr.msra.gmra.mxu0 %vm222_vm6, %v609_v46 }
 0x20e   :  { %v934_v47 = vpop.f32.mrf.mxu1 }
 0x2c9   :  { %v523_v52 = vpop.f32.mrf.mxu0 }
 0x2ca   :  { %v527_v54 = vadd.f32 %v523_v52, %v366_v43 }
 0x2cb   :  { %v929_v53 = vpop.f32.mrf.mxu0 }
 0x2cd   :  { %v683_v55 = vpop.f32.mrf.mxu0 }
 0x2ce   :  { %v687_v57 = vadd.f32 %v683_v55, %v527_v54 }
 0x2cf   :  { %v939_v58 = vpop.f32.mrf.mxu0 }
 0x2d0   :  { %v695_v59 = vadd.f32 %v843_v56, %v687_v57 }
 0x2d2   :  { %v696_v60 = vmax.f32 %v695_v59, 0.0 }
 0x2d4   :  { %949 = vmatmul.mubr.msk.f32.vlgmr.msra.gmra.mxu1 %vm708_vm12, %v696_v60 }
 0x394   :  { %v778_v62 = vpop.f32.mrf.mxu1 }
 0x395   :  { %v779_v63 = vadd.f32 %v844_v61, %v778_v62 }
 0x396   :  { %v950_v0 = vpop.f32.mrf.mxu1 }
 0x397   :  { %v782_v2 = vmax.f32 %v779_v63, 0.0 }
 0x399   :  { %v790_v3 = vmul.f32 %v846_v1, %v782_v2 }
 0x39b   :  { %v791_v4 = vsel %vm708_vm12, %v790_v3, 0.0 }
 0x39c   :  { %792 = vadd.xlane.f32.xlu1 %v791_v4 }
 0x425   :  { %v793_v6 = vpop.xlane.xlu1 %792 }
 0x426   :  { %v801_v7 = vadd.f32 %v847_v5, %v793_v6 }
 0x428   :  { %v848_v8 = vmul.f32 -1.442695, %v801_v7 }
 0x42a   :  { %962 = vpow2.f32 %v848_v8 }
 0x437   :  { %v963_v9 = vpop.eup %962 }
 0x438   :  { %v805_v10 = vadd.f32 1.0, %v963_v9 }
 0x43a   :  { %964 = vrcp.f32 %v805_v10 }
 0x447   :  { %v965_v11 = vpop.eup %964 }
 0x448   :  { %810 = vperm.xlu0 %959, %v965_v11  }
 0x4c3   :  { %v811_v12 = vpop.permute.xlu0 %810 }
 0x4c4   :  { %813 = vst [vmem:[#allocation3] sm:$0xff] %v811_v12 }
 0x4c5   :  { %977 = shalt.err (!%p974_p4)
}
 0x4c6   :  { %823 = dma.vmem_to_hbm [thread:$0]  %s821_s8, 128, %s1200_s11, [#allocation4]  }
 0x4c7   :  { %986 = dma.done.wait [#allocation4], 128  }
 0x4c8   :  { %987 = vsyncadd [#allocation4], 4294967168 }
 0x4c9   :  { %827 = vsyncpa [#allocation4], 1 }

</bundles_post_ra>
